<compile_context>
chip_gen: v7x
topology: tpu7x:2x2x1
jax: 0.10.0
libtpu: 0.0.40
codegen_flags: <defaults>
</compile_context>

<pallas_src>
import jax
import jax.numpy as jnp
from jax.experimental import pallas as pl
from jax.experimental.pallas import tpu as pltpu


_LANE = 128
_TARGET_TILE_BYTES = 8 * 1024 * 1024    # ~8 MiB of x per grid step


def _sublane_multiple(dtype):
    """Min sublane multiple for packed layouts: 8 f32, 16 bf16, 32 int8/fp8."""
    itemsize = jnp.dtype(dtype).itemsize
    return max(8, 32 // itemsize)


def _largest_aligned_divisor(total, step, cap):
    """Largest d <= max(cap, step) with d % step == 0 and total % d == 0.

    Requires total % step == 0 (so `step` itself is always a valid answer).
    """
    best = step
    limit = min(total, max(cap, step))
    for d in range(step, limit + 1, step):
        if total % d == 0:
            best = d
    return best


def _pick_block_n(n, sub, rows_budget, grid_m, num_cores):
    """Batch block: a multiple of `sub` dividing n (or full extent), at most
    rows_budget when possible, preferring an even split of total grid steps
    across TensorCores on 2-core chips."""
    if n % sub != 0:
        return n                       # full-extent block satisfies (8,128) rule
    cap = max(sub, (rows_budget // sub) * sub)
    best_any = sub
    best_even = None
    for d in range(sub, min(n, cap) + 1, sub):
        if n % d == 0:
            best_any = d
            if num_cores < 2 or ((n // d) * grid_m) % num_cores == 0:
                best_even = d
    return best_even if best_even is not None else best_any


def _tpu_vmem_and_cores():
    """(per-core VMEM bytes, TensorCores per device) with conservative fallbacks."""
    vmem_cap = 64 * 1024 * 1024        # v7x per-core VMEM; safe everywhere
    try:
        info = pltpu.get_tpu_info()
        v = int(getattr(info, "vmem_capacity_bytes", 0) or 0)
        if v > 0:
            vmem_cap = v
    except Exception:
        pass
    cores = 1
    try:
        kind = jax.devices()[0].device_kind.lower()
        single_core = any(t in kind for t in ("lite", "v5e", "v6e", "v2", "v3"))
        cores = 1 if single_core else 2   # v4/v5p megacore and v7x have 2 TCs
    except Exception:
        pass
    return vmem_cap, cores


# ----------------------------- Pallas kernel --------------------------------

def _alpha_scale_kernel(x_ref, s_ref, o_ref):
    # x_ref: (block_n, block_m) activations
    # s_ref: (1, block_m) per-element scale for the same lane block
    # Straight aligned vreg multiply (sublane broadcast of the scale row).
    o_ref[...] = (x_ref[...] * s_ref[...]).astype(o_ref.dtype)


def _alpha_scale_pallas(x2, s2, *, donate=False):
    """x2: (N, M) activations; s2: (1, M) per-element scale in x2.dtype."""
    n, m = x2.shape
    itemsize = jnp.dtype(x2.dtype).itemsize
    sub = _sublane_multiple(x2.dtype)
    vmem_cap, num_cores = _tpu_vmem_and_cores()
    target = min(_TARGET_TILE_BYTES, max(1 << 20, vmem_cap // 8))

    # Lane (last) axis: largest 128-aligned divisor within the tile budget;
    # full extent when M is not 128-divisible (still lane-dense for typical M).
    if m % _LANE == 0:
        cap_m = max(_LANE, (target // itemsize) // _LANE * _LANE)
        block_m = _largest_aligned_divisor(m, _LANE, cap_m)
    else:
        block_m = m
    grid_m = m // block_m

    # Batch (sublane) axis: fill the remaining tile budget.  On 2-core chips,
    # if the lane axis doesn't already provide >= 2 steps per core, keep the
    # batch axis supplying balanced work; on 1-core chips never force extra
    # grid steps.
    rows_budget = max(1, target // (block_m * itemsize))
    if num_cores >= 2 and grid_m < 2 * num_cores:
        rows_budget = min(rows_budget, max(1, n // (2 * num_cores)))
    block_n = _pick_block_n(n, sub, rows_budget, grid_m, num_cores)
    grid_n = n // block_n

    # VMEM limit derived from the actual double-buffered footprint.
    tile_bytes = block_n * block_m * itemsize
    scale_bytes = block_m * itemsize
    footprint = 4 * tile_bytes + 2 * scale_bytes + (4 << 20)
    vmem_limit = int(min(vmem_cap, max(footprint, 16 << 20)))

    # Lane axis outermost: the scale block index only changes with `mi`, so it
    # is re-fetched once per lane block (negligible extra traffic).
    grid = (grid_m, grid_n)

    return pl.pallas_call(
        _alpha_scale_kernel,
        out_shape=jax.ShapeDtypeStruct((n, m), x2.dtype),
        grid_spec=pltpu.PrefetchScalarGridSpec(
            num_scalar_prefetch=0,
            grid=grid,
            in_specs=[
                pl.BlockSpec((block_n, block_m), lambda mi, ni: (ni, mi)),
                pl.BlockSpec((1, block_m), lambda mi, ni: (0, mi)),
            ],
            out_specs=pl.BlockSpec((block_n, block_m), lambda mi, ni: (ni, mi)),
        ),
        compiler_params=pltpu.CompilerParams(
            dimension_semantics=("parallel", "parallel"),
            vmem_limit_bytes=vmem_limit,
        ),
        input_output_aliases=({0: 0} if donate else {}),
    )(x2, s2)


# --------------------------- AlphaLayer in JAX -------------------------------

class AlphaLayerPallas:
    def __init__(self, channels, n_block, prob_type="exp", init_alpha=0.5):
        assert prob_type in ("exp", "sigmoid")
        assert n_block >= 0
        self.prob_type = prob_type
        self.channels = channels
        self.input_ch = 24 + n_block * 144
        if self.channels == self.input_ch:
            self.num_groups = 0
            self.min_ch = self.input_ch
            self.alpha = None
        elif self.channels > self.input_ch:
            self.min_ch = 12
            self.group_size = 12
            if self.channels - self.min_ch - self.input_ch == 0:
                self.num_groups = 1
            else:
                self.num_groups = int(
                    (self.channels - self.min_ch - self.input_ch) / self.group_size + 1)
            # deterministic init (args.init_alpha in the original code)
            self.alpha = jnp.ones((self.num_groups,), jnp.float32) * init_alpha
        else:
            raise ValueError("channels < input_ch is not supported by the module")

    def get_marginal_prob(self):
        if self.prob_type == "exp":
            # functional equivalent of the in-place alpha.data.clamp_(min=0)
            p = jnp.exp(-jnp.maximum(self.alpha, 0.0))
        else:  # sigmoid
            p = jax.nn.sigmoid(self.alpha)
        # marginal_prob[i] = prod(p[i:])
        return jnp.flip(jnp.cumprod(jnp.flip(p)))

    def _channel_scale(self):
        """Per-channel scale vector (C,), built with a single small gather."""
        marginal = self.get_marginal_prob()                       # (num_groups,)
        table = jnp.concatenate([marginal, jnp.ones((1,), marginal.dtype)])
        ch = jnp.arange(self.channels)
        # channel -> table index: 0 for the first input_ch channels,
        # g+1 for middle group g, num_groups (-> 1.0) for the last min_ch.
        gidx = jnp.where(
            ch < self.input_ch,
            0,
            jnp.minimum((ch - self.input_ch) // self.group_size + 1,
                        self.num_groups),
        )
        return table[gidx]                                        # (C,)

    def __call__(self, x, *, donate=False):
        # x: (N, C, H, W)
        if self.num_groups == 0:
            return x
        n, c, h, w = x.shape
        assert c == self.channels
        hw = h * w
        m = c * hw
        scale_c = self._channel_scale().astype(x.dtype)           # (C,)
        # Lane-dense layout: per-element scale over the flattened C*H*W axis.
        s2 = jnp.repeat(scale_c, hw).reshape(1, m)                # (1, C*H*W)
        x2 = x.reshape(n, m)
        out2 = _alpha_scale_pallas(x2, s2, donate=donate)
        return out2.reshape(n, c, h, w)


# ------------------------------- reference -----------------------------------

def _reference_forward(layer: AlphaLayerPallas, x):
    if layer.num_groups == 0:
        return x
    scale = layer._channel_scale().astype(x.dtype)
    return x * scale[None, :, None, None]


# --------------------------------- main ---------------------------------------

if __name__ == "__main__":
    # n_block=0 -> input_ch=24; channels=48 -> num_groups = (48-12-24)/12 + 1 = 2.
    key = jax.random.PRNGKey(0)
    layer = AlphaLayerPallas(channels=48, n_block=0, prob_type="exp", init_alpha=0.5)

    # Exercise both the 128-aligned lane path (H*W = 256) and the
    # non-128-aligned full-extent fallback (H*W = 49).
    for (N, C, H, W) in [(2, 48, 16, 16), (2, 48, 7, 7)]:
        key, subkey = jax.random.split(key)
        x = jax.random.normal(subkey, (N, C, H, W), dtype=jnp.float32)
        out = jax.block_until_ready(layer(x))
        ref = _reference_forward(layer, x)
        assert out.shape == x.shape and out.dtype == x.dtype
        assert jnp.allclose(out, ref, atol=1e-6, rtol=1e-6), "mismatch vs reference"

    print("KERNEL_OK")
</pallas_src>

<mosaic_0001>
module attributes {stable_mosaic.version = 11 : i64} {
  func.func @_alpha_scale_kernel(%arg0: i32, %arg1: i32, %arg2: memref<2x12288xf32, #tpu.memory_space<vmem>>, %arg3: memref<1x12288xf32, #tpu.memory_space<vmem>>, %arg4: memref<2x12288xf32, #tpu.memory_space<vmem>>) attributes {dimension_semantics = [#tpu.dimension_semantics<parallel>, #tpu.dimension_semantics<parallel>], iteration_bounds = array<i64: 1, 1>, scalar_prefetch = 0 : i64, scratch_operands = 0 : i64, tpu.core_type = #tpu.core_type<tc>, window_params = [{transform_indices = @transform_0, window_bounds = array<i64: 2, 12288>}, {transform_indices = @transform_1, window_bounds = array<i64: 1, 12288>}, {transform_indices = @transform_2, window_bounds = array<i64: 2, 12288>}]} {
    %c0 = arith.constant 0 : index
    %c0_0 = arith.constant 0 : index
    %0 = vector.load %arg2[%c0, %c0_0] : memref<2x12288xf32, #tpu.memory_space<vmem>>, vector<2x12288xf32>
    %c0_1 = arith.constant 0 : index
    %c0_2 = arith.constant 0 : index
    %1 = vector.load %arg3[%c0_1, %c0_2] : memref<1x12288xf32, #tpu.memory_space<vmem>>, vector<1x12288xf32>
    %2 = vector.broadcast %1 : vector<1x12288xf32> to vector<2x12288xf32>
    %3 = arith.mulf %0, %2 : vector<2x12288xf32>
    %c0_3 = arith.constant 0 : index
    %c0_4 = arith.constant 0 : index
    %4 = vector.load %arg4[%c0_3, %c0_4] : memref<2x12288xf32, #tpu.memory_space<vmem>>, vector<2x12288xf32>
    tpu.vector_store %arg4[%c0_3, %c0_4], %3 {strides = array<i32>} : memref<2x12288xf32, #tpu.memory_space<vmem>>, vector<2x12288xf32>,
    return
  }
  func.func @transform_0(%arg0: i32, %arg1: i32) -> (i32, i32) {
    %c0_i32 = arith.constant 0 : i32
    return %arg1, %arg0 : i32, i32
  }
  func.func @transform_1(%arg0: i32, %arg1: i32) -> (i32, i32) {
    %c0_i32 = arith.constant 0 : i32
    %c0_i32_0 = arith.constant 0 : i32
    return %c0_i32, %arg0 : i32, i32
  }
  func.func @transform_2(%arg0: i32, %arg1: i32) -> (i32, i32) {
    %c0_i32 = arith.constant 0 : i32
    return %arg1, %arg0 : i32, i32
  }
}

</mosaic_0001>

<bundles_post_ra>
// kernel: tpu_custom_call.1
= control target key start
LH: loop header
LB: loop body
LE: loop exit
PB: predicated region body
PF: predicated region fallthrough
CT: control target
= control target key end

     0   :  { %7 = vsyncpa [#allocation3], 0  ;;  %s1257_s0 = inlined_call_operand.hbm [shape: f32[2,12288], index: 0, kind: input, shape index: {}]   ;;  %s1258_s1 = inlined_call_operand.hbm [shape: f32[1,12288], index: 1, kind: input, shape index: {}]   ;;  %s1259_s2 = inlined_call_operand.hbm [shape: f32[2,12288], index: 2, kind: output, shape index: {}]  }
   0x1   :  { %8 = vsyncpa [#allocation6], 0 }
   0x2   :  { %9 = vsyncpa [#allocation4], 0  ;;  %s1040_s9 = smov [#allocation2]   ;;  %s1041_s11 = smov [#allocation5]  }
   0x3   :  { %s16_s10 = sshll.u32 %s1040_s9, 4  ;;  %s26_s12 = sshll.u32 %s1041_s11, 4  ;;  %s17_s10 = int_to_ptr.vmem [resolvable:$true] %s16_s10  ;;  %s27_s12 = int_to_ptr.vmem [resolvable:$true] %s26_s12 }
   0x4   :  { %s968_s15 = scalar_lea.hbm %s1257_s0, 3072 }
   0x5   :  { %p969_p0 = scmp.ne.s32.totalorder %s1257_s0, %s968_s15  ;;  %p972_p1 = scmp.lt.u32.totalorder %s968_s15, %s1257_s0 }
   0x7   :  { %p974_p2 = pnand %p972_p1, %p969_p0 }
   0x9   :  { %977 = shalt.err (!%p974_p2)
}
   0xa   :  { %s978_s20 = scalar_lea.vmem %s17_s10, 3072  ;;  %p983_p4 = scmp.lt.s32.totalorder %s17_s10, %s17_s10 }
   0xb   :  { %p979_p3 = scmp.ne.s32.totalorder %s17_s10, %s978_s20  ;;  %p984_p5 = scmp.lt.s32.totalorder %s978_s20, %s978_s20 }
   0xd   :  { %p985_p6 = por %p984_p5, %p983_p4 }
   0xf   :  { %p986_p7 = pnand %p985_p6, %p979_p3 }
  0x11   :  { %989 = shalt.err (!%p986_p7)
}
  0x12   :  { %19 = dma.hbm_to_vmem [thread:$0]  %s1257_s0, 3072, %s17_s10, [#allocation3]  }
  0x13   :  { %s990_s25 = scalar_lea.hbm %s1258_s1, 1536 }
  0x14   :  { %p991_p8 = scmp.ne.s32.totalorder %s1258_s1, %s990_s25  ;;  %p994_p9 = scmp.lt.u32.totalorder %s990_s25, %s1258_s1 }
  0x16   :  { %p996_p10 = pnand %p994_p9, %p991_p8 }
  0x18   :  { %999 = shalt.err (!%p996_p10)
}
  0x19   :  { %s1000_s30 = scalar_lea.vmem %s27_s12, 1536  ;;  %p1005_p12 = scmp.lt.s32.totalorder %s27_s12, %s27_s12 }
  0x1a   :  { %p1001_p11 = scmp.ne.s32.totalorder %s27_s12, %s1000_s30  ;;  %p1006_p13 = scmp.lt.s32.totalorder %s1000_s30, %s1000_s30 }
  0x1c   :  { %p1007_p0 = por %p1006_p13, %p1005_p12 }
  0x1e   :  { %p1008_p1 = pnand %p1007_p0, %p1001_p11 }
  0x20   :  { %1011 = shalt.err (!%p1008_p1)
}
  0x21   :  { %29 = dma.hbm_to_vmem [thread:$0]  %s1258_s1, 1536, %s27_s12, [#allocation6]  }
  0x22   :  { %1034 = dma.done.wait [#allocation3], 3072  }
  0x23   :  { %1035 = vsyncadd [#allocation3], 4294964224 }
  0x24   :  { %1036 = dma.done.wait [#allocation6], 1536  }
  0x25   :  { %1037 = vsyncadd [#allocation6], 4294965760  ;;  %v84_v0 = vlaneseq  ;;  %v1042_v1 = vmov 1983009808   ;;  %v60_v13 = vld [vmem:[#allocation5] sm:$0xff]  ;;  %v61_v19 = vld [vmem:[#allocation5 + $0x8] sm:$0xff] }
  0x26   :  { %v471_v2 = vunpack.c.l.s4 %v1042_v1  ;;  %v62_v36 = vld [vmem:[#allocation5 + $0x10] sm:$0xff]  ;;  %v36_v37 = vld [vmem:[#allocation2] sm:$0xff]  ;;  %v37_v43 = vld [vmem:[#allocation2 + $0x8] sm:$0xff]  ;;  %s1043_s1 = smov [#allocation7]  }
  0x27   :  { %v85_v3 = vshrl.u32 %v84_v0, 7  ;;  %v38_v52 = vld [vmem:[#allocation2 + $0x10] sm:$0xff]  ;;  %v63_v60 = vld [vmem:[#allocation5 + $0x18] sm:$0xff]  ;;  %s954_s4 = sshll.u32 %s1043_s1, 4  ;;  %s955_s4 = int_to_ptr.vmem [resolvable:$true] %s954_s4 }
  0x28   :  { %v472_v4 = vunpack.c.0.s8 %v471_v2  ;;  %v39_v2 = vld [vmem:[#allocation2 + $0x18] sm:$0xff]  ;;  %s1012_s5 = scalar_lea.vmem %s955_s4, 3072  ;;  %p1017_p3 = scmp.lt.s32.totalorder %s955_s4, %s955_s4 }
  0x29   :  { %v1083_v5 = vsub.s32 0, %v85_v3  ;;  %v1085_v6 = vsub.s32 1, %v85_v3  ;;  %v1087_v7 = vsub.s32 2, %v85_v3  ;;  %v1089_v8 = vsub.s32 3, %v85_v3  ;;  %p1013_p2 = scmp.ne.s32.totalorder %s955_s4, %s1012_s5  ;;  %p1018_p4 = scmp.lt.s32.totalorder %s1012_s5, %s1012_s5 }
  0x2a   :  { %v1091_v9 = vsub.s32 4, %v85_v3  ;;  %v1093_v10 = vsub.s32 5, %v85_v3  ;;  %v1095_v11 = vsub.s32 6, %v85_v3  ;;  %v1097_v12 = vsub.s32 7, %v85_v3 }
  0x2b   :  { %v1099_v14 = vsub.s32 %v472_v4, %v85_v3  ;;  %v87_v15 = vrot.slane %v60_v13, %v1083_v5  ;;  %v91_v16 = vrot.slane %v60_v13, %v1085_v6  ;;  %v95_v17 = vrot.slane %v60_v13, %v1087_v7  ;;  %p1019_p5 = por %p1018_p4, %p1017_p3 }
  0x2c   :  { %v99_v18 = vrot.slane %v60_v13, %v1089_v8  ;;  %v103_v20 = vrot.slane %v60_v13, %v1091_v9  ;;  %v107_v21 = vrot.slane %v60_v13, %v1093_v10  ;;  %v111_v22 = vrot.slane %v60_v13, %v1095_v11 }
  0x2d   :  { %v115_v23 = vrot.slane %v60_v13, %v1097_v12  ;;  %v468_v24 = vcombine.low %v87_v15, %v91_v16  ;;  %v119_v26 = vrot.slane %v61_v19, %v1083_v5  ;;  %v123_v27 = vrot.slane %v61_v19, %v1085_v6  ;;  %p1020_p6 = pnand %p1019_p5, %p1013_p2 }
  0x2e   :  { %v469_v25 = vcombine.low %v95_v17, %v99_v18  ;;  %v485_v28 = vcombine.low %v103_v20, %v107_v21  ;;  %v127_v30 = vrot.slane %v61_v19, %v1087_v7  ;;  %v131_v31 = vrot.slane %v61_v19, %v1089_v8 }
  0x2f   :  { %v486_v29 = vcombine.low %v111_v22, %v115_v23  ;;  %v476_v32 = vrot.slane %v468_v24, %v1099_v14  ;;  %v502_v34 = vcombine.low %v119_v26, %v123_v27  ;;  %v135_v35 = vrot.slane %v61_v19, %v1091_v9  ;;  %v64_v23 = vld [vmem:[#allocation5 + $0x20] sm:$0xff] }
  0x30   :  { %v483_v33 = vrot.slane %v469_v25, %v1099_v14  ;;  %v493_v38 = vrot.slane %v485_v28, %v1099_v14  ;;  %v503_v40 = vcombine.low %v127_v30, %v131_v31  ;;  %v139_v41 = vrot.slane %v61_v19, %v1093_v10  ;;  %v40_v25 = vld [vmem:[#allocation2 + $0x20] sm:$0xff] }
  0x31   :  { %v500_v39 = vrot.slane %v486_v29, %v1099_v14  ;;  %v510_v44 = vrot.slane %v502_v34, %v1099_v14  ;;  %v143_v45 = vrot.slane %v61_v19, %v1095_v11  ;;  %v147_v46 = vrot.slane %v61_v19, %v1097_v12 }
  0x32   :  { %v484_v42 = vcombine.low %v476_v32, %v483_v33  ;;  %v517_v48 = vrot.slane %v503_v40, %v1099_v14  ;;  %v519_v49 = vcombine.low %v135_v35, %v139_v41  ;;  %v151_v50 = vrot.slane %v62_v36, %v1083_v5  ;;  %v41_v33 = vld [vmem:[#allocation2 + $0x28] sm:$0xff] }
  0x33   :  { %v501_v47 = vcombine.low %v493_v38, %v500_v39  ;;  %v520_v53 = vcombine.low %v143_v45, %v147_v46  ;;  %v155_v54 = vrot.slane %v62_v36, %v1085_v6  ;;  %v159_v55 = vrot.slane %v62_v36, %v1087_v7  ;;  %v65_v46 = vld [vmem:[#allocation5 + $0x28] sm:$0xff] }
  0x34   :  { %v900_v51 = vmul.f32 %v484_v42, %v36_v37  ;;  %v518_v57 = vcombine.low %v510_v44, %v517_v48  ;;  %v527_v58 = vrot.slane %v519_v49, %v1099_v14  ;;  %v163_v59 = vrot.slane %v62_v36, %v1089_v8  ;;  %v42_v48 = vld [vmem:[#allocation2 + $0x30] sm:$0xff] }
  0x35   :  { %v901_v56 = vmul.f32 %v501_v47, %v37_v43  ;;  %v534_v61 = vrot.slane %v520_v53, %v1099_v14  ;;  %v536_v62 = vcombine.low %v151_v50, %v155_v54  ;;  %v167_v63 = vrot.slane %v62_v36, %v1091_v9 }
  0x36   :  { %924 = vst [vmem:[#allocation7] sm:$0xff] %v900_v51  ;;  %v171_v0 = vrot.slane %v62_v36, %v1093_v10  ;;  %v902_v1 = vmul.f32 %v518_v57, %v38_v52  ;;  %v537_v3 = vcombine.low %v159_v55, %v163_v59  ;;  %v175_v4 = vrot.slane %v62_v36, %v1095_v11 }
  0x37   :  { %925 = vst [vmem:[#allocation7 + $0x8] sm:$0xff] %v901_v56  ;;  %v179_v13 = vrot.slane %v62_v36, %v1097_v12  ;;  %v535_v15 = vcombine.low %v527_v58, %v534_v61  ;;  %v544_v16 = vrot.slane %v536_v62, %v1099_v14  ;;  %v183_v18 = vrot.slane %v63_v60, %v1083_v5  ;;  %v43_v56 = vld [vmem:[#allocation2 + $0x38] sm:$0xff] }
  0x38   :  { %v553_v17 = vcombine.low %v167_v63, %v171_v0  ;;  %926 = vst [vmem:[#allocation7 + $0x10] sm:$0xff] %v902_v1  ;;  %v551_v19 = vrot.slane %v537_v3, %v1099_v14  ;;  %v187_v21 = vrot.slane %v63_v60, %v1085_v6  ;;  %v191_v22 = vrot.slane %v63_v60, %v1087_v7 }
  0x39   :  { %v554_v20 = vcombine.low %v175_v4, %v179_v13  ;;  %v903_v24 = vmul.f32 %v535_v15, %v39_v2  ;;  %v195_v27 = vrot.slane %v63_v60, %v1089_v8  ;;  %v199_v28 = vrot.slane %v63_v60, %v1091_v9  ;;  %v66_v13 = vld [vmem:[#allocation5 + $0x30] sm:$0xff] }
  0x3a   :  { %v561_v26 = vrot.slane %v553_v17, %v1099_v14  ;;  %v552_v29 = vcombine.low %v544_v16, %v551_v19  ;;  %v570_v31 = vcombine.low %v183_v18, %v187_v21  ;;  %v203_v32 = vrot.slane %v63_v60, %v1093_v10  ;;  %v44_v16 = vld [vmem:[#allocation2 + $0x40] sm:$0xff] }
  0x3b   :  { %v568_v30 = vrot.slane %v554_v20, %v1099_v14  ;;  %927 = vst [vmem:[#allocation7 + $0x18] sm:$0xff] %v903_v24  ;;  %v571_v34 = vcombine.low %v191_v22, %v195_v27  ;;  %v207_v35 = vrot.slane %v63_v60, %v1095_v11  ;;  %v211_v36 = vrot.slane %v63_v60, %v1097_v12  ;;  %v45_v24 = vld [vmem:[#allocation2 + $0x48] sm:$0xff] }
  0x3c   :  { %v215_v37 = vrot.slane %v64_v23, %v1083_v5  ;;  %v904_v38 = vmul.f32 %v552_v29, %v40_v25  ;;  %v578_v40 = vrot.slane %v570_v31, %v1099_v14  ;;  %v587_v41 = vcombine.low %v199_v28, %v203_v32 }
  0x3d   :  { %v569_v39 = vcombine.low %v561_v26, %v568_v30  ;;  %v585_v42 = vrot.slane %v571_v34, %v1099_v14  ;;  %v588_v43 = vcombine.low %v207_v35, %v211_v36  ;;  %v219_v44 = vrot.slane %v64_v23, %v1085_v6 }
  0x3e   :  { %v223_v45 = vrot.slane %v64_v23, %v1087_v7  ;;  %928 = vst [vmem:[#allocation7 + $0x20] sm:$0xff] %v904_v38  ;;  %v595_v49 = vrot.slane %v587_v41, %v1099_v14  ;;  %v227_v50 = vrot.slane %v64_v23, %v1089_v8  ;;  %v231_v51 = vrot.slane %v64_v23, %v1091_v9 }
  0x3f   :  { %v905_v47 = vmul.f32 %v569_v39, %v41_v33  ;;  %v586_v52 = vcombine.low %v578_v40, %v585_v42  ;;  %v602_v53 = vrot.slane %v588_v43, %v1099_v14  ;;  %v604_v54 = vcombine.low %v215_v37, %v219_v44  ;;  %v67_v37 = vld [vmem:[#allocation5 + $0x38] sm:$0xff]  ;;  %v46_v39 = vld [vmem:[#allocation2 + $0x50] sm:$0xff] }
  0x40   :  { %v235_v55 = vrot.slane %v64_v23, %v1093_v10  ;;  %v605_v57 = vcombine.low %v223_v45, %v227_v50  ;;  %v239_v58 = vrot.slane %v64_v23, %v1095_v11  ;;  %v243_v59 = vrot.slane %v64_v23, %v1097_v12 }
  0x41   :  { %929 = vst [vmem:[#allocation7 + $0x28] sm:$0xff] %v905_v47  ;;  %v247_v60 = vrot.slane %v65_v46, %v1083_v5  ;;  %v906_v61 = vmul.f32 %v586_v52, %v42_v48  ;;  %v603_v62 = vcombine.low %v595_v49, %v602_v53  ;;  %v612_v63 = vrot.slane %v604_v54, %v1099_v14  ;;  %v47_v47 = vld [vmem:[#allocation2 + $0x58] sm:$0xff] }
  0x42   :  { %v621_v0 = vcombine.low %v231_v51, %v235_v55  ;;  %v619_v1 = vrot.slane %v605_v57, %v1099_v14  ;;  %v622_v2 = vcombine.low %v239_v58, %v243_v59  ;;  %v251_v3 = vrot.slane %v65_v46, %v1085_v6 }
  0x43   :  { %v255_v4 = vrot.slane %v65_v46, %v1087_v7  ;;  %930 = vst [vmem:[#allocation7 + $0x30] sm:$0xff] %v906_v61  ;;  %v907_v15 = vmul.f32 %v603_v62, %v43_v56  ;;  %v259_v18 = vrot.slane %v65_v46, %v1089_v8  ;;  %v263_v19 = vrot.slane %v65_v46, %v1091_v9  ;;  %v48_v62 = vld [vmem:[#allocation2 + $0x60] sm:$0xff] }
  0x44   :  { %v629_v17 = vrot.slane %v621_v0, %v1099_v14  ;;  %v620_v20 = vcombine.low %v612_v63, %v619_v1  ;;  %v636_v21 = vrot.slane %v622_v2, %v1099_v14  ;;  %v638_v22 = vcombine.low %v247_v60, %v251_v3  ;;  %v68_v60 = vld [vmem:[#allocation5 + $0x40] sm:$0xff] }
  0x45   :  { %v267_v23 = vrot.slane %v65_v46, %v1093_v10  ;;  %931 = vst [vmem:[#allocation7 + $0x38] sm:$0xff] %v907_v15  ;;  %v639_v25 = vcombine.low %v255_v4, %v259_v18  ;;  %v271_v26 = vrot.slane %v65_v46, %v1095_v11  ;;  %v275_v27 = vrot.slane %v65_v46, %v1097_v12  ;;  %v49_v15 = vld [vmem:[#allocation2 + $0x68] sm:$0xff] }
  0x46   :  { %v279_v28 = vrot.slane %v66_v13, %v1083_v5  ;;  %v908_v29 = vmul.f32 %v620_v20, %v44_v16  ;;  %v637_v30 = vcombine.low %v629_v17, %v636_v21  ;;  %v646_v31 = vrot.slane %v638_v22, %v1099_v14 }
  0x47   :  { %v655_v32 = vcombine.low %v263_v19, %v267_v23  ;;  %v653_v33 = vrot.slane %v639_v25, %v1099_v14  ;;  %v656_v34 = vcombine.low %v271_v26, %v275_v27  ;;  %v283_v35 = vrot.slane %v66_v13, %v1085_v6 }
  0x48   :  { %v287_v36 = vrot.slane %v66_v13, %v1087_v7  ;;  %932 = vst [vmem:[#allocation7 + $0x40] sm:$0xff] %v908_v29  ;;  %v909_v38 = vmul.f32 %v637_v30, %v45_v24  ;;  %v291_v41 = vrot.slane %v66_v13, %v1089_v8  ;;  %v295_v42 = vrot.slane %v66_v13, %v1091_v9  ;;  %v50_v30 = vld [vmem:[#allocation2 + $0x70] sm:$0xff] }
  0x49   :  { %v663_v40 = vrot.slane %v655_v32, %v1099_v14  ;;  %v654_v43 = vcombine.low %v646_v31, %v653_v33  ;;  %v670_v44 = vrot.slane %v656_v34, %v1099_v14  ;;  %v672_v45 = vcombine.low %v279_v28, %v283_v35  ;;  %v69_v28 = vld [vmem:[#allocation5 + $0x48] sm:$0xff] }
  0x4a   :  { %v299_v46 = vrot.slane %v66_v13, %v1093_v10  ;;  %933 = vst [vmem:[#allocation7 + $0x48] sm:$0xff] %v909_v38  ;;  %v673_v48 = vcombine.low %v287_v36, %v291_v41  ;;  %v303_v49 = vrot.slane %v66_v13, %v1095_v11  ;;  %v307_v50 = vrot.slane %v66_v13, %v1097_v12  ;;  %v51_v38 = vld [vmem:[#allocation2 + $0x78] sm:$0xff] }
  0x4b   :  { %v311_v51 = vrot.slane %v67_v37, %v1083_v5  ;;  %v910_v52 = vmul.f32 %v654_v43, %v46_v39  ;;  %v671_v53 = vcombine.low %v663_v40, %v670_v44  ;;  %v680_v54 = vrot.slane %v672_v45, %v1099_v14 }
  0x4c   :  { %v689_v55 = vcombine.low %v295_v42, %v299_v46  ;;  %v687_v56 = vrot.slane %v673_v48, %v1099_v14  ;;  %v690_v57 = vcombine.low %v303_v49, %v307_v50  ;;  %v315_v58 = vrot.slane %v67_v37, %v1085_v6 }
  0x4d   :  { %v319_v59 = vrot.slane %v67_v37, %v1087_v7  ;;  %934 = vst [vmem:[#allocation7 + $0x50] sm:$0xff] %v910_v52  ;;  %v911_v61 = vmul.f32 %v671_v53, %v47_v47  ;;  %v323_v0 = vrot.slane %v67_v37, %v1089_v8  ;;  %v327_v1 = vrot.slane %v67_v37, %v1091_v9  ;;  %v52_v53 = vld [vmem:[#allocation2 + $0x80] sm:$0xff] }
  0x4e   :  { %v697_v63 = vrot.slane %v689_v55, %v1099_v14  ;;  %v688_v2 = vcombine.low %v680_v54, %v687_v56  ;;  %v704_v3 = vrot.slane %v690_v57, %v1099_v14  ;;  %v706_v4 = vcombine.low %v311_v51, %v315_v58  ;;  %v70_v51 = vld [vmem:[#allocation5 + $0x50] sm:$0xff] }
  0x4f   :  { %v331_v13 = vrot.slane %v67_v37, %v1093_v10  ;;  %935 = vst [vmem:[#allocation7 + $0x58] sm:$0xff] %v911_v61  ;;  %v707_v16 = vcombine.low %v319_v59, %v323_v0  ;;  %v335_v17 = vrot.slane %v67_v37, %v1095_v11  ;;  %v339_v18 = vrot.slane %v67_v37, %v1097_v12  ;;  %v53_v61 = vld [vmem:[#allocation2 + $0x88] sm:$0xff] }
  0x50   :  { %v343_v19 = vrot.slane %v68_v60, %v1083_v5  ;;  %v912_v20 = vmul.f32 %v688_v2, %v48_v62  ;;  %v705_v21 = vcombine.low %v697_v63, %v704_v3  ;;  %v714_v22 = vrot.slane %v706_v4, %v1099_v14 }
  0x51   :  { %v723_v23 = vcombine.low %v327_v1, %v331_v13  ;;  %v721_v24 = vrot.slane %v707_v16, %v1099_v14  ;;  %v724_v25 = vcombine.low %v335_v17, %v339_v18  ;;  %v347_v26 = vrot.slane %v68_v60, %v1085_v6 }
  0x52   :  { %v351_v27 = vrot.slane %v68_v60, %v1087_v7  ;;  %936 = vst [vmem:[#allocation7 + $0x60] sm:$0xff] %v912_v20  ;;  %v913_v29 = vmul.f32 %v705_v21, %v49_v15  ;;  %v355_v32 = vrot.slane %v68_v60, %v1089_v8  ;;  %v359_v33 = vrot.slane %v68_v60, %v1091_v9  ;;  %v54_v21 = vld [vmem:[#allocation2 + $0x90] sm:$0xff] }
  0x53   :  { %v731_v31 = vrot.slane %v723_v23, %v1099_v14  ;;  %v722_v34 = vcombine.low %v714_v22, %v721_v24  ;;  %v738_v35 = vrot.slane %v724_v25, %v1099_v14  ;;  %v740_v36 = vcombine.low %v343_v19, %v347_v26  ;;  %v71_v19 = vld [vmem:[#allocation5 + $0x58] sm:$0xff] }
  0x54   :  { %v363_v37 = vrot.slane %v68_v60, %v1093_v10  ;;  %937 = vst [vmem:[#allocation7 + $0x68] sm:$0xff] %v913_v29  ;;  %v741_v39 = vcombine.low %v351_v27, %v355_v32  ;;  %v367_v40 = vrot.slane %v68_v60, %v1095_v11  ;;  %v371_v41 = vrot.slane %v68_v60, %v1097_v12  ;;  %v55_v29 = vld [vmem:[#allocation2 + $0x98] sm:$0xff] }
  0x55   :  { %v375_v42 = vrot.slane %v69_v28, %v1083_v5  ;;  %v914_v43 = vmul.f32 %v722_v34, %v50_v30  ;;  %v739_v44 = vcombine.low %v731_v31, %v738_v35  ;;  %v748_v45 = vrot.slane %v740_v36, %v1099_v14 }
  0x56   :  { %v757_v46 = vcombine.low %v359_v33, %v363_v37  ;;  %v755_v47 = vrot.slane %v741_v39, %v1099_v14  ;;  %v758_v48 = vcombine.low %v367_v40, %v371_v41  ;;  %v379_v49 = vrot.slane %v69_v28, %v1085_v6 }
  0x57   :  { %v383_v50 = vrot.slane %v69_v28, %v1087_v7  ;;  %938 = vst [vmem:[#allocation7 + $0x70] sm:$0xff] %v914_v43  ;;  %v915_v52 = vmul.f32 %v739_v44, %v51_v38  ;;  %v387_v55 = vrot.slane %v69_v28, %v1089_v8  ;;  %v391_v56 = vrot.slane %v69_v28, %v1091_v9  ;;  %v56_v43 = vld [vmem:[#allocation2 + $0xa0] sm:$0xff] }
  0x58   :  { %v765_v54 = vrot.slane %v757_v46, %v1099_v14  ;;  %v756_v57 = vcombine.low %v748_v45, %v755_v47  ;;  %v772_v58 = vrot.slane %v758_v48, %v1099_v14  ;;  %v774_v59 = vcombine.low %v375_v42, %v379_v49 }
  0x59   :  { %v395_v60 = vrot.slane %v69_v28, %v1093_v10  ;;  %939 = vst [vmem:[#allocation7 + $0x78] sm:$0xff] %v915_v52  ;;  %v775_v62 = vcombine.low %v383_v50, %v387_v55  ;;  %v399_v63 = vrot.slane %v69_v28, %v1095_v11  ;;  %v403_v0 = vrot.slane %v69_v28, %v1097_v12  ;;  %v57_v50 = vld [vmem:[#allocation2 + $0xa8] sm:$0xff] }
  0x5a   :  { %v407_v1 = vrot.slane %v70_v51, %v1083_v5  ;;  %v916_v2 = vmul.f32 %v756_v57, %v52_v53  ;;  %v773_v3 = vcombine.low %v765_v54, %v772_v58  ;;  %v782_v4 = vrot.slane %v774_v59, %v1099_v14  ;;  %v58_v57 = vld [vmem:[#allocation2 + $0xb0] sm:$0xff] }
  0x5b   :  { %v791_v13 = vcombine.low %v391_v56, %v395_v60  ;;  %v789_v15 = vrot.slane %v775_v62, %v1099_v14  ;;  %v792_v16 = vcombine.low %v399_v63, %v403_v0  ;;  %v411_v17 = vrot.slane %v70_v51, %v1085_v6 }
  0x5c   :  { %v415_v18 = vrot.slane %v70_v51, %v1087_v7  ;;  %940 = vst [vmem:[#allocation7 + $0x80] sm:$0xff] %v916_v2  ;;  %v917_v20 = vmul.f32 %v773_v3, %v53_v61  ;;  %v419_v23 = vrot.slane %v70_v51, %v1089_v8  ;;  %v423_v24 = vrot.slane %v70_v51, %v1091_v9 }
  0x5d   :  { %v799_v22 = vrot.slane %v791_v13, %v1099_v14  ;;  %v790_v25 = vcombine.low %v782_v4, %v789_v15  ;;  %v806_v26 = vrot.slane %v792_v16, %v1099_v14  ;;  %v808_v27 = vcombine.low %v407_v1, %v411_v17 }
  0x5e   :  { %v427_v28 = vrot.slane %v70_v51, %v1093_v10  ;;  %941 = vst [vmem:[#allocation7 + $0x88] sm:$0xff] %v917_v20  ;;  %v809_v30 = vcombine.low %v415_v18, %v419_v23  ;;  %v431_v31 = vrot.slane %v70_v51, %v1095_v11  ;;  %v435_v32 = vrot.slane %v70_v51, %v1097_v12 }
  0x5f   :  { %v439_v33 = vrot.slane %v71_v19, %v1083_v5  ;;  %v918_v34 = vmul.f32 %v790_v25, %v54_v21  ;;  %v807_v35 = vcombine.low %v799_v22, %v806_v26  ;;  %v816_v36 = vrot.slane %v808_v27, %v1099_v14 }
  0x60   :  { %v825_v37 = vcombine.low %v423_v24, %v427_v28  ;;  %v823_v38 = vrot.slane %v809_v30, %v1099_v14  ;;  %v826_v39 = vcombine.low %v431_v31, %v435_v32  ;;  %v443_v40 = vrot.slane %v71_v19, %v1085_v6 }
  0x61   :  { %v447_v41 = vrot.slane %v71_v19, %v1087_v7  ;;  %942 = vst [vmem:[#allocation7 + $0x90] sm:$0xff] %v918_v34  ;;  %v919_v42 = vmul.f32 %v807_v35, %v55_v29  ;;  %v451_v45 = vrot.slane %v71_v19, %v1089_v8  ;;  %v455_v5 = vrot.slane %v71_v19, %v1091_v9 }
  0x62   :  { %v833_v44 = vrot.slane %v825_v37, %v1099_v14  ;;  %v824_v46 = vcombine.low %v816_v36, %v823_v38  ;;  %v840_v47 = vrot.slane %v826_v39, %v1099_v14  ;;  %v842_v48 = vcombine.low %v439_v33, %v443_v40 }
  0x63   :  { %v459_v49 = vrot.slane %v71_v19, %v1093_v10  ;;  %943 = vst [vmem:[#allocation7 + $0x98] sm:$0xff] %v919_v42  ;;  %v843_v6 = vcombine.low %v447_v41, %v451_v45  ;;  %v463_v7 = vrot.slane %v71_v19, %v1095_v11  ;;  %v467_v51 = vrot.slane %v71_v19, %v1097_v12  ;;  %v59_v11 = vld [vmem:[#allocation2 + $0xb8] sm:$0xff] }
  0x64   :  { %v920_v52 = vmul.f32 %v824_v46, %v56_v43  ;;  %v841_v53 = vcombine.low %v833_v44, %v840_v47  ;;  %v850_v54 = vrot.slane %v842_v48, %v1099_v14 }
  0x65   :  { %v859_v8 = vcombine.low %v455_v5, %v459_v49  ;;  %v857_v9 = vrot.slane %v843_v6, %v1099_v14  ;;  %v860_v55 = vcombine.low %v463_v7, %v467_v51 }
  0x66   :  { %944 = vst [vmem:[#allocation7 + $0xa0] sm:$0xff] %v920_v52  ;;  %v921_v56 = vmul.f32 %v841_v53, %v57_v50 }
  0x67   :  { %v867_v10 = vrot.slane %v859_v8, %v1099_v14  ;;  %v858_v58 = vcombine.low %v850_v54, %v857_v9  ;;  %v874_v59 = vrot.slane %v860_v55, %v1099_v14 }
  0x68   :  { %945 = vst [vmem:[#allocation7 + $0xa8] sm:$0xff] %v921_v56 }
  0x69   :  { %v922_v12 = vmul.f32 %v858_v58, %v58_v57  ;;  %v875_v60 = vcombine.low %v867_v10, %v874_v59 }
  0x6b   :  { %946 = vst [vmem:[#allocation7 + $0xb0] sm:$0xff] %v922_v12  ;;  %v923_v61 = vmul.f32 %v875_v60, %v59_v11 }
  0x6d   :  { %947 = vst [vmem:[#allocation7 + $0xb8] sm:$0xff] %v923_v61 }
  0x6e   :  { %1023 = shalt.err (!%p1020_p6)
}
  0x6f   :  { %s1024_s8 = scalar_lea.hbm %s1259_s2, 3072 }
  0x70   :  { %p1025_p7 = scmp.ne.s32.totalorder %s1259_s2, %s1024_s8  ;;  %p1028_p8 = scmp.lt.u32.totalorder %s1024_s8, %s1259_s2 }
  0x72   :  { %p1030_p9 = pnand %p1028_p8, %p1025_p7 }
  0x74   :  { %1033 = shalt.err (!%p1030_p9)
}
  0x75   :  { %957 = dma.vmem_to_hbm [thread:$0]  %s955_s4, 3072, %s1259_s2, [#allocation4]  }
  0x76   :  { %1038 = dma.done.wait [#allocation4], 3072  }
  0x77   :  { %1039 = vsyncadd [#allocation4], 4294964224 }
  0x78   :  { %961 = vsyncpa [#allocation3], 1 }
  0x79   :  { %962 = vsyncpa [#allocation6], 1 }
  0x7a   :  { %963 = vsyncpa [#allocation4], 1 }

</bundles_post_ra>
